<compile_context>
chip_gen: v6e
topology: v6e:2x2x1
jax: 0.10.0
libtpu: 0.0.40
codegen_flags: <defaults>
</compile_context>

<pallas_src>
import functools

import jax
import jax.numpy as jnp
from jax import lax
from jax.experimental import pallas as pl
from jax.experimental.pallas import tpu as pltpu

_LANES = 128     # TPU lane width; feature axes are padded up to this
_EPS = 1e-5      # PyTorch nn.LayerNorm default eps


def _round_up(n, m):
    return ((n + m - 1) // m) * m


def _fused_mlp_kernel(x_ref, w1_ref, p1_ref, wh_ref, ph_ref, o_ref, h_scr,
                      *, layer_n, inv_h):
    """One batch tile through fc1 + layer_N hidden layers, fully in VMEM."""

    def bias_relu_ln(h, p):
        # h: (TB, Hp) f32.  p: (8, Hp) slab; rows 0/1/2 = bias / gamma / beta.
        b, g, beta = p[0:1, :], p[1:2, :], p[2:3, :]
        h = jnp.maximum(h + b, 0.0)                              # bias + ReLU
        # Padded columns are exactly 0, so sums over Hp equal sums over real H;
        # divide by the real hidden size (inv_h = 1/H).
        mean = jnp.sum(h, axis=-1, keepdims=True) * inv_h
        ex2 = jnp.sum(h * h, axis=-1, keepdims=True) * inv_h
        var = ex2 - mean * mean                                  # one-pass variance
        inv_std = lax.rsqrt(var + _EPS)                          # EUP (free slot)
        # gamma/beta are 0 in padded columns -> padded columns stay exactly 0.
        return (h - mean) * inv_std * g + beta

    # fc1: (TB, Dp) @ (Dp, Hp) on the MXU, f32 accumulation.
    h = jnp.dot(x_ref[...], w1_ref[...], preferred_element_type=jnp.float32)
    h_scr[...] = bias_relu_ln(h, p1_ref[...])

    # fc2 clones: activation stays in VMEM scratch; static trip count -> unrolled.
    for l in range(layer_n):
        h = jnp.dot(h_scr[...], wh_ref[l], preferred_element_type=jnp.float32)
        h_scr[...] = bias_relu_ln(h, ph_ref[l])

    o_ref[...] = h_scr[...].astype(o_ref.dtype)


def pack_mlp_params(params, input_dim, hidden_size):
    """Zero-pad & stack per-layer (w, b, gamma, beta) into lane-dense slabs."""
    Dp = _round_up(input_dim, _LANES)
    Hp = _round_up(hidden_size, _LANES)
    n_hidden = len(params) - 1

    def pad_w(w, rows, cols):
        out = jnp.zeros((rows, cols), jnp.float32)
        return out.at[: w.shape[0], : w.shape[1]].set(w.astype(jnp.float32))

    def pad_slab(b, g, beta):
        slab = jnp.zeros((8, Hp), jnp.float32)
        slab = slab.at[0, :hidden_size].set(b.astype(jnp.float32))
        slab = slab.at[1, :hidden_size].set(g.astype(jnp.float32))
        slab = slab.at[2, :hidden_size].set(beta.astype(jnp.float32))
        return slab

    w1, b1, g1, be1 = params[0]
    w1p = pad_w(w1, Dp, Hp)
    p1 = pad_slab(b1, g1, be1)

    if n_hidden > 0:
        whp = jnp.stack([pad_w(w, Hp, Hp) for (w, _, _, _) in params[1:]])
        php = jnp.stack([pad_slab(b, g, be) for (_, b, g, be) in params[1:]])
    else:
        whp = jnp.zeros((1, Hp, Hp), jnp.float32)   # dummy; loop never executes
        php = jnp.zeros((1, 8, Hp), jnp.float32)
    return (w1p, p1, whp, php)


@functools.partial(
    jax.jit, static_argnames=("input_dim", "hidden_size", "layer_n", "tile_b"))
def mlp_layer_forward(x, packed, *, input_dim, hidden_size, layer_n, tile_b=None):
    w1p, p1, whp, php = packed
    B = x.shape[0]
    Dp, Hp = w1p.shape
    L = whp.shape[0]

    if tile_b is None:
        # Largest batch tile that still leaves >=2 grid steps (feeds both v7x
        # TensorCores); capped so big batches stay well inside VMEM.
        tile_b = B if B <= 8 else min(512, max(8, B // 2))
    assert B % tile_b == 0, "batch must be divisible by the batch tile"

    # Zero-pad the input feature axis to the lane width (padded columns stay 0).
    x_p = jnp.zeros((B, Dp), jnp.float32).at[:, :input_dim].set(
        x.astype(jnp.float32))

    kernel = functools.partial(
        _fused_mlp_kernel, layer_n=layer_n, inv_h=1.0 / float(hidden_size))

    out = pl.pallas_call(
        kernel,
        out_shape=jax.ShapeDtypeStruct((B, Hp), jnp.float32),
        grid_spec=pltpu.PrefetchScalarGridSpec(
            num_scalar_prefetch=0,
            grid=(B // tile_b,),
            in_specs=[
                pl.BlockSpec((tile_b, Dp), lambda i: (i, 0)),     # x batch tile
                pl.BlockSpec((Dp, Hp), lambda i: (0, 0)),         # fc1 weight (invariant)
                pl.BlockSpec((8, Hp), lambda i: (0, 0)),          # fc1 b/gamma/beta slab
                pl.BlockSpec((L, Hp, Hp), lambda i: (0, 0, 0)),   # stacked fc2 weights
                pl.BlockSpec((L, 8, Hp), lambda i: (0, 0, 0)),    # stacked fc2 slabs
            ],
            out_specs=pl.BlockSpec((tile_b, Hp), lambda i: (i, 0)),
            scratch_shapes=[pltpu.VMEM((tile_b, Hp), jnp.float32)],
        ),
        compiler_params=pltpu.CompilerParams(
            dimension_semantics=("parallel",),
        ),
    )(x_p, w1p, p1, whp, php)

    return out[:, :hidden_size]


def init_mlp_params(key, input_dim, hidden_size, layer_N):
    """Deterministic synthetic init (stand-in for orthogonal_(gain=sqrt(2)), bias=0)."""
    params = []
    dims_in = [input_dim] + [hidden_size] * layer_N
    gain = jnp.sqrt(2.0)                      # nn.init.calculate_gain('relu')
    for d_in in dims_in:
        key, kw = jax.random.split(key)
        w = gain * jax.random.normal(kw, (d_in, hidden_size), jnp.float32) / jnp.sqrt(d_in)
        b = jnp.zeros((hidden_size,), jnp.float32)       # constant_(0)
        gamma = jnp.ones((hidden_size,), jnp.float32)    # LayerNorm weight
        beta = jnp.zeros((hidden_size,), jnp.float32)    # LayerNorm bias
        params.append((w, b, gamma, beta))
    return params


def _reference(x, params):
    h = x
    for (w, b, g, be) in params:
        h = jnp.maximum(h @ w + b, 0.0)
        mean = jnp.mean(h, axis=-1, keepdims=True)
        var = jnp.mean((h - mean) ** 2, axis=-1, keepdims=True)
        h = (h - mean) * lax.rsqrt(var + _EPS) * g + be
    return h


if __name__ == "__main__":
    key = jax.random.PRNGKey(0)
    batch, input_dim, hidden_size, layer_N = 16, 24, 32, 2

    kx, kp = jax.random.split(key)
    x = jax.random.normal(kx, (batch, input_dim), jnp.float32)
    params = init_mlp_params(kp, input_dim, hidden_size, layer_N)
    packed = pack_mlp_params(params, input_dim, hidden_size)

    out = mlp_layer_forward(x, packed, input_dim=input_dim,
                            hidden_size=hidden_size, layer_n=layer_N)
    out = jax.block_until_ready(out)

    ref = _reference(x, params)
    assert out.shape == (batch, hidden_size)
    assert jnp.allclose(out, ref, atol=1e-4, rtol=1e-4), "mismatch vs pure-JAX reference"

    print("KERNEL_OK")
</pallas_src>

<mosaic_0001>
module attributes {stable_mosaic.version = 11 : i64} {
  func.func @_fused_mlp_kernel(%arg0: i32, %arg1: memref<8x128xf32, #tpu.memory_space<vmem>>, %arg2: memref<128x128xf32, #tpu.memory_space<vmem>>, %arg3: memref<8x128xf32, #tpu.memory_space<vmem>>, %arg4: memref<2x128x128xf32, #tpu.memory_space<vmem>>, %arg5: memref<2x8x128xf32, #tpu.memory_space<vmem>>, %arg6: memref<8x128xf32, #tpu.memory_space<vmem>>, %arg7: memref<8x128xf32, #tpu.memory_space<vmem>>) attributes {dimension_semantics = [#tpu.dimension_semantics<parallel>], iteration_bounds = array<i64: 2>, scalar_prefetch = 0 : i64, scratch_operands = 1 : i64, tpu.core_type = #tpu.core_type<tc>, window_params = [{transform_indices = @transform_0, window_bounds = array<i64: 8, 128>}, {pipeline_mode = #tpu.pipeline_mode<synchronous>, transform_indices = @transform_1, window_bounds = array<i64: 128, 128>}, {pipeline_mode = #tpu.pipeline_mode<synchronous>, transform_indices = @transform_2, window_bounds = array<i64: 8, 128>}, {pipeline_mode = #tpu.pipeline_mode<synchronous>, transform_indices = @transform_3, window_bounds = array<i64: 2, 128, 128>}, {pipeline_mode = #tpu.pipeline_mode<synchronous>, transform_indices = @transform_4, window_bounds = array<i64: 2, 8, 128>}, {transform_indices = @transform_5, window_bounds = array<i64: 8, 128>}]} {
    %c0 = arith.constant 0 : index
    %c0_0 = arith.constant 0 : index
    %0 = vector.load %arg1[%c0, %c0_0] : memref<8x128xf32, #tpu.memory_space<vmem>>, vector<8x128xf32>
    %c0_1 = arith.constant 0 : index
    %c0_2 = arith.constant 0 : index
    %1 = vector.load %arg2[%c0_1, %c0_2] : memref<128x128xf32, #tpu.memory_space<vmem>>, vector<128x128xf32>
    %cst = arith.constant dense<0.000000e+00> : vector<8x128xf32>
    %2 = tpu.matmul %0, %1, %cst {dimension_numbers = #tpu.dot_dimension_numbers<[1], [0], [0], [1], [0, 0, 1, 1], [], []>} : vector<8x128xf32>, vector<128x128xf32>, vector<8x128xf32> -> vector<8x128xf32>
    %c0_3 = arith.constant 0 : index
    %c0_4 = arith.constant 0 : index
    %3 = vector.load %arg3[%c0_3, %c0_4] : memref<8x128xf32, #tpu.memory_space<vmem>>, vector<8x128xf32>
    %4 = vector.extract_strided_slice %3 {offsets = [0, 0], sizes = [1, 128], strides = [1, 1]} : vector<8x128xf32> to vector<1x128xf32>
    %5 = vector.extract_strided_slice %3 {offsets = [1, 0], sizes = [1, 128], strides = [1, 1]} : vector<8x128xf32> to vector<1x128xf32>
    %6 = vector.extract_strided_slice %3 {offsets = [2, 0], sizes = [1, 128], strides = [1, 1]} : vector<8x128xf32> to vector<1x128xf32>
    %7 = vector.broadcast %4 : vector<1x128xf32> to vector<8x128xf32>
    %8 = arith.addf %2, %7 : vector<8x128xf32>
    %cst_5 = arith.constant 0.000000e+00 : f32
    %9 = vector.broadcast %cst_5 : f32 to vector<8x128xf32>
    %10 = arith.maximumf %8, %9 : vector<8x128xf32>
    %cst_6 = arith.constant dense<0.000000e+00> : vector<8xf32>
    %11 = vector.multi_reduction <add>, %10, %cst_6 [1] : vector<8x128xf32> to vector<8xf32>
    %12 = vector.shape_cast %11 : vector<8xf32> to vector<8x1xf32>
    %cst_7 = arith.constant 3.125000e-02 : f32
    %13 = vector.broadcast %cst_7 : f32 to vector<8x1xf32>
    %14 = arith.mulf %12, %13 : vector<8x1xf32>
    %15 = arith.mulf %10, %10 : vector<8x128xf32>
    %cst_8 = arith.constant dense<0.000000e+00> : vector<8xf32>
    %16 = vector.multi_reduction <add>, %15, %cst_8 [1] : vector<8x128xf32> to vector<8xf32>
    %17 = vector.shape_cast %16 : vector<8xf32> to vector<8x1xf32>
    %cst_9 = arith.constant 3.125000e-02 : f32
    %18 = vector.broadcast %cst_9 : f32 to vector<8x1xf32>
    %19 = arith.mulf %17, %18 : vector<8x1xf32>
    %20 = arith.mulf %14, %14 : vector<8x1xf32>
    %21 = arith.subf %19, %20 : vector<8x1xf32>
    %cst_10 = arith.constant 9.99999974E-6 : f32
    %22 = vector.broadcast %cst_10 : f32 to vector<8x1xf32>
    %23 = arith.addf %21, %22 : vector<8x1xf32>
    %24 = math.rsqrt %23 : vector<8x1xf32>
    %25 = vector.broadcast %14 : vector<8x1xf32> to vector<8x128xf32>
    %26 = arith.subf %10, %25 : vector<8x128xf32>
    %27 = vector.broadcast %24 : vector<8x1xf32> to vector<8x128xf32>
    %28 = arith.mulf %26, %27 : vector<8x128xf32>
    %29 = vector.broadcast %5 : vector<1x128xf32> to vector<8x128xf32>
    %30 = arith.mulf %28, %29 : vector<8x128xf32>
    %31 = vector.broadcast %6 : vector<1x128xf32> to vector<8x128xf32>
    %32 = arith.addf %30, %31 : vector<8x128xf32>
    %c0_11 = arith.constant 0 : index
    %c0_12 = arith.constant 0 : index
    %33 = vector.load %arg7[%c0_11, %c0_12] : memref<8x128xf32, #tpu.memory_space<vmem>>, vector<8x128xf32>
    tpu.vector_store %arg7[%c0_11, %c0_12], %32 {strides = array<i32>} : memref<8x128xf32, #tpu.memory_space<vmem>>, vector<8x128xf32>,
    %c0_13 = arith.constant 0 : index
    %c0_14 = arith.constant 0 : index
    %34 = vector.load %arg7[%c0_13, %c0_14] : memref<8x128xf32, #tpu.memory_space<vmem>>, vector<8x128xf32>
    %c0_15 = arith.constant 0 : index
    %c0_16 = arith.constant 0 : index
    %c0_17 = arith.constant 0 : index
    %35 = vector.load %arg4[%c0_15, %c0_16, %c0_17] : memref<2x128x128xf32, #tpu.memory_space<vmem>>, vector<1x128x128xf32>
    %36 = vector.shape_cast %35 : vector<1x128x128xf32> to vector<128x128xf32>
    %cst_18 = arith.constant dense<0.000000e+00> : vector<8x128xf32>
    %37 = tpu.matmul %34, %36, %cst_18 {dimension_numbers = #tpu.dot_dimension_numbers<[1], [0], [0], [1], [0, 0, 1, 1], [], []>} : vector<8x128xf32>, vector<128x128xf32>, vector<8x128xf32> -> vector<8x128xf32>
    %c0_19 = arith.constant 0 : index
    %c0_20 = arith.constant 0 : index
    %c0_21 = arith.constant 0 : index
    %38 = vector.load %arg5[%c0_19, %c0_20, %c0_21] : memref<2x8x128xf32, #tpu.memory_space<vmem>>, vector<1x8x128xf32>
    %39 = vector.shape_cast %38 : vector<1x8x128xf32> to vector<8x128xf32>
    %40 = vector.extract_strided_slice %39 {offsets = [0, 0], sizes = [1, 128], strides = [1, 1]} : vector<8x128xf32> to vector<1x128xf32>
    %41 = vector.extract_strided_slice %39 {offsets = [1, 0], sizes = [1, 128], strides = [1, 1]} : vector<8x128xf32> to vector<1x128xf32>
    %42 = vector.extract_strided_slice %39 {offsets = [2, 0], sizes = [1, 128], strides = [1, 1]} : vector<8x128xf32> to vector<1x128xf32>
    %43 = vector.broadcast %40 : vector<1x128xf32> to vector<8x128xf32>
    %44 = arith.addf %37, %43 : vector<8x128xf32>
    %cst_22 = arith.constant 0.000000e+00 : f32
    %45 = vector.broadcast %cst_22 : f32 to vector<8x128xf32>
    %46 = arith.maximumf %44, %45 : vector<8x128xf32>
    %cst_23 = arith.constant dense<0.000000e+00> : vector<8xf32>
    %47 = vector.multi_reduction <add>, %46, %cst_23 [1] : vector<8x128xf32> to vector<8xf32>
    %48 = vector.shape_cast %47 : vector<8xf32> to vector<8x1xf32>
    %cst_24 = arith.constant 3.125000e-02 : f32
    %49 = vector.broadcast %cst_24 : f32 to vector<8x1xf32>
    %50 = arith.mulf %48, %49 : vector<8x1xf32>
    %51 = arith.mulf %46, %46 : vector<8x128xf32>
    %cst_25 = arith.constant dense<0.000000e+00> : vector<8xf32>
    %52 = vector.multi_reduction <add>, %51, %cst_25 [1] : vector<8x128xf32> to vector<8xf32>
    %53 = vector.shape_cast %52 : vector<8xf32> to vector<8x1xf32>
    %cst_26 = arith.constant 3.125000e-02 : f32
    %54 = vector.broadcast %cst_26 : f32 to vector<8x1xf32>
    %55 = arith.mulf %53, %54 : vector<8x1xf32>
    %56 = arith.mulf %50, %50 : vector<8x1xf32>
    %57 = arith.subf %55, %56 : vector<8x1xf32>
    %cst_27 = arith.constant 9.99999974E-6 : f32
    %58 = vector.broadcast %cst_27 : f32 to vector<8x1xf32>
    %59 = arith.addf %57, %58 : vector<8x1xf32>
    %60 = math.rsqrt %59 : vector<8x1xf32>
    %61 = vector.broadcast %50 : vector<8x1xf32> to vector<8x128xf32>
    %62 = arith.subf %46, %61 : vector<8x128xf32>
    %63 = vector.broadcast %60 : vector<8x1xf32> to vector<8x128xf32>
    %64 = arith.mulf %62, %63 : vector<8x128xf32>
    %65 = vector.broadcast %41 : vector<1x128xf32> to vector<8x128xf32>
    %66 = arith.mulf %64, %65 : vector<8x128xf32>
    %67 = vector.broadcast %42 : vector<1x128xf32> to vector<8x128xf32>
    %68 = arith.addf %66, %67 : vector<8x128xf32>
    %c0_28 = arith.constant 0 : index
    %c0_29 = arith.constant 0 : index
    %69 = vector.load %arg7[%c0_28, %c0_29] : memref<8x128xf32, #tpu.memory_space<vmem>>, vector<8x128xf32>
    tpu.vector_store %arg7[%c0_28, %c0_29], %68 {strides = array<i32>} : memref<8x128xf32, #tpu.memory_space<vmem>>, vector<8x128xf32>,
    %c0_30 = arith.constant 0 : index
    %c0_31 = arith.constant 0 : index
    %70 = vector.load %arg7[%c0_30, %c0_31] : memref<8x128xf32, #tpu.memory_space<vmem>>, vector<8x128xf32>
    %c1 = arith.constant 1 : index
    %c0_32 = arith.constant 0 : index
    %c0_33 = arith.constant 0 : index
    %71 = vector.load %arg4[%c1, %c0_32, %c0_33] : memref<2x128x128xf32, #tpu.memory_space<vmem>>, vector<1x128x128xf32>
    %72 = vector.shape_cast %71 : vector<1x128x128xf32> to vector<128x128xf32>
    %cst_34 = arith.constant dense<0.000000e+00> : vector<8x128xf32>
    %73 = tpu.matmul %70, %72, %cst_34 {dimension_numbers = #tpu.dot_dimension_numbers<[1], [0], [0], [1], [0, 0, 1, 1], [], []>} : vector<8x128xf32>, vector<128x128xf32>, vector<8x128xf32> -> vector<8x128xf32>
    %c1_35 = arith.constant 1 : index
    %c0_36 = arith.constant 0 : index
    %c0_37 = arith.constant 0 : index
    %74 = vector.load %arg5[%c1_35, %c0_36, %c0_37] : memref<2x8x128xf32, #tpu.memory_space<vmem>>, vector<1x8x128xf32>
    %75 = vector.shape_cast %74 : vector<1x8x128xf32> to vector<8x128xf32>
    %76 = vector.extract_strided_slice %75 {offsets = [0, 0], sizes = [1, 128], strides = [1, 1]} : vector<8x128xf32> to vector<1x128xf32>
    %77 = vector.extract_strided_slice %75 {offsets = [1, 0], sizes = [1, 128], strides = [1, 1]} : vector<8x128xf32> to vector<1x128xf32>
    %78 = vector.extract_strided_slice %75 {offsets = [2, 0], sizes = [1, 128], strides = [1, 1]} : vector<8x128xf32> to vector<1x128xf32>
    %79 = vector.broadcast %76 : vector<1x128xf32> to vector<8x128xf32>
    %80 = arith.addf %73, %79 : vector<8x128xf32>
    %cst_38 = arith.constant 0.000000e+00 : f32
    %81 = vector.broadcast %cst_38 : f32 to vector<8x128xf32>
    %82 = arith.maximumf %80, %81 : vector<8x128xf32>
    %cst_39 = arith.constant dense<0.000000e+00> : vector<8xf32>
    %83 = vector.multi_reduction <add>, %82, %cst_39 [1] : vector<8x128xf32> to vector<8xf32>
    %84 = vector.shape_cast %83 : vector<8xf32> to vector<8x1xf32>
    %cst_40 = arith.constant 3.125000e-02 : f32
    %85 = vector.broadcast %cst_40 : f32 to vector<8x1xf32>
    %86 = arith.mulf %84, %85 : vector<8x1xf32>
    %87 = arith.mulf %82, %82 : vector<8x128xf32>
    %cst_41 = arith.constant dense<0.000000e+00> : vector<8xf32>
    %88 = vector.multi_reduction <add>, %87, %cst_41 [1] : vector<8x128xf32> to vector<8xf32>
    %89 = vector.shape_cast %88 : vector<8xf32> to vector<8x1xf32>
    %cst_42 = arith.constant 3.125000e-02 : f32
    %90 = vector.broadcast %cst_42 : f32 to vector<8x1xf32>
    %91 = arith.mulf %89, %90 : vector<8x1xf32>
    %92 = arith.mulf %86, %86 : vector<8x1xf32>
    %93 = arith.subf %91, %92 : vector<8x1xf32>
    %cst_43 = arith.constant 9.99999974E-6 : f32
    %94 = vector.broadcast %cst_43 : f32 to vector<8x1xf32>
    %95 = arith.addf %93, %94 : vector<8x1xf32>
    %96 = math.rsqrt %95 : vector<8x1xf32>
    %97 = vector.broadcast %86 : vector<8x1xf32> to vector<8x128xf32>
    %98 = arith.subf %82, %97 : vector<8x128xf32>
    %99 = vector.broadcast %96 : vector<8x1xf32> to vector<8x128xf32>
    %100 = arith.mulf %98, %99 : vector<8x128xf32>
    %101 = vector.broadcast %77 : vector<1x128xf32> to vector<8x128xf32>
    %102 = arith.mulf %100, %101 : vector<8x128xf32>
    %103 = vector.broadcast %78 : vector<1x128xf32> to vector<8x128xf32>
    %104 = arith.addf %102, %103 : vector<8x128xf32>
    %c0_44 = arith.constant 0 : index
    %c0_45 = arith.constant 0 : index
    %105 = vector.load %arg7[%c0_44, %c0_45] : memref<8x128xf32, #tpu.memory_space<vmem>>, vector<8x128xf32>
    tpu.vector_store %arg7[%c0_44, %c0_45], %104 {strides = array<i32>} : memref<8x128xf32, #tpu.memory_space<vmem>>, vector<8x128xf32>,
    %c0_46 = arith.constant 0 : index
    %c0_47 = arith.constant 0 : index
    %106 = vector.load %arg7[%c0_46, %c0_47] : memref<8x128xf32, #tpu.memory_space<vmem>>, vector<8x128xf32>
    %c0_48 = arith.constant 0 : index
    %c0_49 = arith.constant 0 : index
    %107 = vector.load %arg6[%c0_48, %c0_49] : memref<8x128xf32, #tpu.memory_space<vmem>>, vector<8x128xf32>
    tpu.vector_store %arg6[%c0_48, %c0_49], %106 {strides = array<i32>} : memref<8x128xf32, #tpu.memory_space<vmem>>, vector<8x128xf32>,
    return
  }
  func.func @transform_0(%arg0: i32) -> (i32, i32) {
    %c0_i32 = arith.constant 0 : i32
    %c0_i32_0 = arith.constant 0 : i32
    return %arg0, %c0_i32 : i32, i32
  }
  func.func @transform_1(%arg0: i32) -> (i32, i32) {
    %c0_i32 = arith.constant 0 : i32
    %c0_i32_0 = arith.constant 0 : i32
    %c0_i32_1 = arith.constant 0 : i32
    return %c0_i32, %c0_i32_0 : i32, i32
  }
  func.func @transform_2(%arg0: i32) -> (i32, i32) {
    %c0_i32 = arith.constant 0 : i32
    %c0_i32_0 = arith.constant 0 : i32
    %c0_i32_1 = arith.constant 0 : i32
    return %c0_i32, %c0_i32_0 : i32, i32
  }
  func.func @transform_3(%arg0: i32) -> (i32, i32, i32) {
    %c0_i32 = arith.constant 0 : i32
    %c0_i32_0 = arith.constant 0 : i32
    %c0_i32_1 = arith.constant 0 : i32
    %c0_i32_2 = arith.constant 0 : i32
    return %c0_i32, %c0_i32_0, %c0_i32_1 : i32, i32, i32
  }
  func.func @transform_4(%arg0: i32) -> (i32, i32, i32) {
    %c0_i32 = arith.constant 0 : i32
    %c0_i32_0 = arith.constant 0 : i32
    %c0_i32_1 = arith.constant 0 : i32
    %c0_i32_2 = arith.constant 0 : i32
    return %c0_i32, %c0_i32_0, %c0_i32_1 : i32, i32, i32
  }
  func.func @transform_5(%arg0: i32) -> (i32, i32) {
    %c0_i32 = arith.constant 0 : i32
    %c0_i32_0 = arith.constant 0 : i32
    return %arg0, %c0_i32 : i32, i32
  }
}

</mosaic_0001>

<bundles_post_ra>
// kernel: mlp_layer_forward.1
= control target key start
LH: loop header
LB: loop body
LE: loop exit
PB: predicated region body
PF: predicated region fallthrough
CT: control target
= control target key end

     0   :  { %10 = vsyncpa [#allocation4], 0  ;;  %s1321_s0 = inlined_call_operand.vmem [shape: f32[16,128], index: 0, kind: input, shape index: {}]   ;;  %s1322_s1 = inlined_call_operand.hbm [shape: f32[128,128], index: 1, kind: input, shape index: {}]   ;;  %s1323_s2 = inlined_call_operand.vmem [shape: f32[8,128], index: 2, kind: input, shape index: {}]   ;;  %s1324_s3 = inlined_call_operand.hbm [shape: f32[2,128,128], index: 3, kind: input, shape index: {}]   ;;  %s1325_s4 = inlined_call_operand.vmem [shape: f32[2,8,128], index: 4, kind: input, shape index: {}]   ;;  %s1326_s5 = inlined_call_operand.hbm [shape: f32[16,128], index: 5, kind: output, shape index: {}]  }
   0x1   :  { %11 = vsyncpa [#allocation7], 0 }
   0x2   :  { %12 = vsyncpa [#allocation5], 0 }
   0x3   :  { %14 = vsyncpa [#allocation5 + $0x1], 0  ;;  %s1100_s18 = smov 0   ;;  %s1102_s19 = smov 0  }
   0x4   :  { %s1104_s20 = smov 0   ;;  %s1106_s21 = smov 0  }
   0x5 LB: > { %s1121_s22 = sadd.s32 4294967295, %s1061_s21   ;;  %s700_s23 = sadd.s32 4294967294, %s1061_s21   ;;  %s1061_s21 = sphi %s1106_s21, %s1340_s21   ;;  %s1057_s20 = sphi %s1104_s20, %s1339_s20   ;;  %s1053_s19 = sphi %s1102_s19, %s1338_s19   ;;  %s1049_s18 = sphi %s1100_s18, %s1337_s18  }
   0x6   : > { %s1125_s24 = sadd.s32 1, %s1061_s21   ;;  %s137_s25 = sadd.s32 1, %s1057_s20 }
   0x7   : > { %s134_s26 = ssub.s32 %s1061_s21, %s1125_s24  ;;  %p147_p0 = scmp.ne.s32.totalorder %s1057_s20, %s1053_s19 }
   0x8   : > { %p135_p1 = scmp.eq.s32.totalorder %s134_s26, 0  ;;  %p148_p2 = scmp.eq.s32.totalorder %s1121_s22, 1 }
   0x9   : > { %p153_p3 = scmp.ne.s32.totalorder %s1053_s19, %s1049_s18  ;;  %p154_p4 = scmp.eq.s32.totalorder %s700_s23, 1 }
   0xa   : > { %s1136_s27 = scalar_select %p135_p1, %s1057_s20, %s137_s25  }
   0xb   : > { %p1138_p5 = por %p148_p2, %p147_p0  ;;  %p1142_p6 = por %p154_p4, %p153_p3 }
   0xc   : > { %p701_p7 = scmp.ge.s32.totalorder %s1061_s21, 1  ;;  %p161_p8 = scmp.lt.s32.totalorder %s1061_s21, 3 }
   0xd   : > { %s1329_s29 = scalar_select %p1142_p6, 1, 0 }
   0xe   : > { %p1327_p9 = scmp.eq.s32.totalorder %s1121_s22, 0  ;;  %p1149_p10 = pnand %p701_p7, %p161_p8 }
   0xf   : > { %s1063_s6 = smov [#allocation3]   ;;  %s1064_s9 = smov [#allocation6]  }
  0x10   : > { %s173_s7 = sshll.u32 %s1063_s6, 4  ;;  %p881_p11 = pneg %p1149_p10  ;;  %s174_s7 = int_to_ptr.vmem [resolvable:$true] %s173_s7 }
  0x11   : > { %s189_s10 = sshll.u32 %s1064_s9, 4  ;;  %s952_s11 = scalar_lea.vmem %s174_s7, 2048  ;;  %s190_s10 = int_to_ptr.vmem [resolvable:$true] %s189_s10 }
  0x12   : > { %p1157_p12 = pnand %p1327_p9, %p881_p11  ;;  %p953_p0 = scmp.ne.s32.totalorder %s174_s7, %s952_s11 }
  0x13   : > { %p960_p3 = scmp.lt.s32.totalorder %s174_s7, %s174_s7  ;;  %p961_p4 = scmp.lt.s32.totalorder %s952_s11, %s952_s11 }
  0x14   : > { %p943_p13 = pneg %p1157_p12 }
  0x15   : > { %p962_p7 = por %p961_p4, %p960_p3 }
  0x16   : > { %p955_p1 = pnand %p953_p0, %p943_p13 }
  0x18   : > { %p956_p2 = pneg %p955_p1 }
  0x1a   : > { %p963_p8 = pnand %p962_p7, %p956_p2 }
  0x1c   : > { %966 = shalt.err (!%p963_p8)
}
  0x1d   : > { %s1065_s12 = smov 128   ;;  %s1066_s13 = smov 8  }
  0x1e   : > { %884 = dma.hbm_to_vmem [thread:$0]  (!%p1157_p12), %s1322_s1, 2048, %s174_s7, [#allocation4], %s1065_s12, %s1065_s12, %s1066_s13  }
  0x1f   : > { %s978_s16 = scalar_lea.vmem %s190_s10, 4096  ;;  %p986_p9 = scmp.lt.s32.totalorder %s190_s10, %s190_s10 }
  0x20   : > { %p979_p11 = scmp.ne.s32.totalorder %s190_s10, %s978_s16  ;;  %p987_p6 = scmp.lt.s32.totalorder %s978_s16, %s978_s16 }
  0x22   : > { %p981_p0 = pnand %p979_p11, %p943_p13  ;;  %p988_p3 = por %p987_p6, %p986_p9 }
  0x24   : > { %p982_p1 = pneg %p981_p0 }
  0x26   : > { %p989_p2 = pnand %p988_p3, %p982_p1 }
  0x28   : > { %992 = shalt.err (!%p989_p2)
}
  0x29   : > { %887 = dma.hbm_to_vmem [thread:$0]  (!%p1157_p12), %s1324_s3, 4096, %s190_s10, [#allocation7], %s1065_s12, %s1065_s12, %s1066_s13  }
  0x2a   : > { %215 = sbr.rel (%p1149_p10) target bundleno = 1191 (0x4a7), region = 40  ;;  %p1332_p4 = scmp.eq.s32.totalorder (!%p1149_p10), %s1121_s22, 0 }
  0x2f   : > { %1036 = dma.done.wait (%p1332_p4), [#allocation4], 2048   ;;  %p1333_p13 = pmov %p1332_p4 }
  0x30   : > { %p1334_p7 = pmov %p1332_p4 }
  0x31   : > { %1038 = vsyncadd (%p1333_p13), [#allocation4], 4294965248 }
  0x32   : > { %1040 = dma.done.wait (%p1334_p7), [#allocation7], 4096   ;;  %p1335_p6 = pmov %p1332_p4 }
  0x33   : > { %v1067_v0 = vmov 0.0   ;;  %vm1068_vm0 = vmmov 0   ;;  %v266_v1 = vld [vmem:[#allocation3 + $0x78] sm:$0xff]  ;;  %v265_v2 = vld [vmem:[#allocation3 + $0x70] sm:$0xff]  ;;  %v264_v3 = vld [vmem:[#allocation3 + $0x68] sm:$0xff]  ;;  %p246_p9 = scmp.lt.s32.totalorder %s1121_s22, 1  ;;  %v268_v19 = vlaneseq }
  0x34   : > { %1042 = vsyncadd (%p1335_p6), [#allocation7], 4294963200  ;;  %766 = vmatprep.subr.mxu0 %v1067_v0  ;;  %798 = vmatprep.mubr.msk.f32.mxu0 %vm1068_vm0, %v1067_v0  ;;  %v263_v4 = vld [vmem:[#allocation3 + $0x60] sm:$0xff]  ;;  %v262_v5 = vld [vmem:[#allocation3 + $0x58] sm:$0xff]  ;;  %s243_s14 = sand.u32 1, %s1053_s19   ;;  %s712_s16 = sshll.u32 %s1121_s22, 7 }
  0x35   : > { %801 = vmatprep.subr.mxu1 %v1067_v0  ;;  %833 = vmatprep.mubr.msk.f32.mxu1 %vm1068_vm0, %v1067_v0  ;;  %v261_v6 = vld [vmem:[#allocation3 + $0x50] sm:$0xff]  ;;  %v260_v7 = vld [vmem:[#allocation3 + $0x48] sm:$0xff]  ;;  %v259_v8 = vld [vmem:[#allocation3 + $0x40] sm:$0xff]  ;;  %s247_s25 = scalar_select %p246_p9, %s1121_s22, 1  ;;  %v1219_v20 = vshrl.u32 %v268_v19, 7 }
  0x36   : > { %767 = vmatpush3.msra.mxu0 %v266_v1  ;;  %v258_v9 = vld [vmem:[#allocation3 + $0x38] sm:$0xff]  ;;  %v257_v10 = vld [vmem:[#allocation3 + $0x30] sm:$0xff]  ;;  %v256_v11 = vld [vmem:[#allocation3 + $0x28] sm:$0xff]  ;;  %s708_s15 = sshll.u32 %s243_s14, 3  ;;  %s617_s30 = scalar_lea.hbm %s1326_s5, %s712_s16 }
  0x37   : > { %768 = vmatprep.subr.mxu0 %v1067_v0  ;;  %v255_v12 = vld [vmem:[#allocation3 + $0x20] sm:$0xff]  ;;  %v254_v13 = vld [vmem:[#allocation3 + $0x18] sm:$0xff]  ;;  %s709_s26 = sshll.u32 %s247_s25, 3  ;;  %v253_v14 = vld [vmem:[#allocation3 + $0x10] sm:$0xff]  ;;  %v1222_v21 = vsub.s32 0, %v1219_v20  ;;  %v1246_v51 = vsub.s32 1, %v1219_v20 }
  0x38   : > { %769 = vmatpush3.msra.mxu0 %v265_v2  ;;  %v252_v15 = vld [vmem:[#allocation3 + $0x8] sm:$0xff]  ;;  %s249_s7 = scalar_lea.vmem %s1321_s0, %s709_s26  ;;  %v251_v16 = vld [vmem:[#allocation3] sm:$0xff]  ;;  %v383_v18 = vld [vmem:[#allocation6 + $0x78] sm:$0xff]  ;;  %v1249_v52 = vsub.s32 2, %v1219_v20  ;;  %s245_s17 = scalar_lea.vmem [#allocation8], %s708_s15 }
  0x39   : > { %770 = vmatprep.subr.mxu0 %v1067_v0  ;;  %v250_v17 = vld [vmem:[%s249_s7] sm:$0xff]  ;;  %802 = vmatpush3.msra.mxu1 %v383_v18  ;;  %v382_v29 = vld [vmem:[#allocation6 + $0x70] sm:$0xff]  ;;  %v381_v30 = vld [vmem:[#allocation6 + $0x68] sm:$0xff]  ;;  %s619_s23 = sshll.u32 %s245_s17, 4  ;;  %s606_s6 = scalar_lea.sflag [#allocation5], %s243_s14  ;;  %s620_s23 = int_to_ptr.vmem [resolvable:$true] %s619_s23 }
  0x3a   : > { %771 = vmatpush3.msra.mxu0 %v264_v3  ;;  %803 = vmatprep.subr.mxu1 %v1067_v0  ;;  %v1227_v22 = vld [vmem:[%s1323_s2] sm:$0xff]  ;;  %v379_v32 = vld [vmem:[#allocation6 + $0x58] sm:$0xff]  ;;  %v378_v33 = vld [vmem:[#allocation6 + $0x50] sm:$0xff]  ;;  %s993_s7 = scalar_lea.vmem %s620_s23, 128  ;;  %s1069_s8 = smov [#allocation8]  }
  0x3b   : > { %772 = vmatprep.subr.mxu0 %v1067_v0  ;;  %v271_v23 = vrot.slane %v1227_v22, %v1222_v21  ;;  %804 = vmatpush3.msra.mxu1 %v382_v29  ;;  %v380_v31 = vld [vmem:[#allocation6 + $0x60] sm:$0xff]  ;;  %v377_v34 = vld [vmem:[#allocation6 + $0x48] sm:$0xff]  ;;  %v375_v36 = vld [vmem:[#allocation6 + $0x38] sm:$0xff]  ;;  %v359_v53 = vrot.slane %v1227_v22, %v1246_v51  ;;  %v364_v57 = vrot.slane %v1227_v22, %v1249_v52  ;;  %p994_p10 = scmp.ne.s32.totalorder %s620_s23, %s993_s7  ;;  %s997_s9 = sshll.u32 %s1069_s8, 4  ;;  %s998_s9 = int_to_ptr.vmem [resolvable:$false] %s997_s9 }
  0x3c   : > { %773 = vmatpush3.msra.mxu0 %v263_v4  ;;  %805 = vmatprep.subr.mxu1 %v1067_v0  ;;  %v376_v35 = vld [vmem:[#allocation6 + $0x40] sm:$0xff]  ;;  %v374_v37 = vld [vmem:[#allocation6 + $0x30] sm:$0xff]  ;;  %v373_v38 = vld [vmem:[#allocation6 + $0x28] sm:$0xff]  ;;  %s999_s22 = scalar_lea.vmem %s998_s9, 256  ;;  %p1000_p11 = scmp.lt.s32.totalorder %s620_s23, %s998_s9 }
  0x3d   : > { %774 = vmatprep.subr.mxu0 %v1067_v0  ;;  %806 = vmatpush3.msra.mxu1 %v381_v30  ;;  %v372_v39 = vld [vmem:[#allocation6 + $0x20] sm:$0xff]  ;;  %v371_v40 = vld [vmem:[#allocation6 + $0x18] sm:$0xff]  ;;  %v370_v41 = vld [vmem:[#allocation6 + $0x10] sm:$0xff]  ;;  %p995_p12 = pnand %p994_p10, %p1138_p5  ;;  %p1001_p0 = scmp.lt.s32.totalorder %s999_s22, %s993_s7 }
  0x3e   : > { %775 = vmatpush3.msra.mxu0 %v262_v5  ;;  %807 = vmatprep.subr.mxu1 %v1067_v0  ;;  %v369_v42 = vld [vmem:[#allocation6 + $0x8] sm:$0xff]  ;;  %v368_v43 = vld [vmem:[#allocation6] sm:$0xff]  ;;  %v501_v60 = vld [vmem:[#allocation6 + $0xf8] sm:$0xff] }
  0x3f   : > { %776 = vmatprep.subr.mxu0 %v1067_v0  ;;  %808 = vmatpush3.msra.mxu1 %v380_v31  ;;  %v1259_v61 = vld [vmem:[%s1325_s4] sm:$0xff]  ;;  %v500_v5 = vld [vmem:[#allocation6 + $0xf0] sm:$0xff]  ;;  %v487_v18 = vld [vmem:[#allocation6 + $0x88] sm:$0xff]  ;;  %p996_p8 = pneg %p995_p12  ;;  %p1002_p1 = por %p1001_p0, %p1000_p11 }
  0x40   : > { %777 = vmatpush3.msra.mxu0 %v261_v6  ;;  %809 = vmatprep.subr.mxu1 %v1067_v0  ;;  %v388_v62 = vrot.slane %v1259_v61, %v1222_v21  ;;  %v499_v6 = vld [vmem:[#allocation6 + $0xe8] sm:$0xff]  ;;  %v486_v19 = vld [vmem:[#allocation6 + $0x80] sm:$0xff]  ;;  %v481_v31 = vrot.slane %v1259_v61, %v1249_v52 }
  0x41   : > { %778 = vmatprep.subr.mxu0 %v1067_v0  ;;  %810 = vmatpush3.msra.mxu1 %v379_v32  ;;  %p1003_p3 = pnand %p1002_p1, %p996_p8 }
  0x42   : > { %779 = vmatpush3.msra.mxu0 %v260_v7  ;;  %811 = vmatprep.subr.mxu1 %v1067_v0  ;;  %v498_v7 = vld [vmem:[#allocation6 + $0xe0] sm:$0xff] }
  0x43   : > { %780 = vmatprep.subr.mxu0 %v1067_v0  ;;  %812 = vmatpush3.msra.mxu1 %v378_v33 }
  0x44   : > { %781 = vmatpush3.msra.mxu0 %v259_v8  ;;  %813 = vmatprep.subr.mxu1 %v1067_v0  ;;  %v497_v8 = vld [vmem:[#allocation6 + $0xd8] sm:$0xff] }
  0x45   : > { %782 = vmatprep.subr.mxu0 %v1067_v0  ;;  %814 = vmatpush3.msra.mxu1 %v377_v34  ;;  %v710_v34 = vld [vmem:[%s1325_s4 + $0x8] sm:$0xff] }
  0x46   : > { %783 = vmatpush3.msra.mxu0 %v258_v9  ;;  %815 = vmatprep.subr.mxu1 %v1067_v0  ;;  %v496_v9 = vld [vmem:[#allocation6 + $0xd0] sm:$0xff] }
  0x47   : > { %784 = vmatprep.subr.mxu0 %v1067_v0  ;;  %816 = vmatpush3.msra.mxu1 %v376_v35  ;;  %v507_v35 = vrot.slane %v710_v34, %v1222_v21  ;;  %v595_v21 = vrot.slane %v710_v34, %v1246_v51 }
  0x48   : > { %785 = vmatpush3.msra.mxu0 %v257_v10  ;;  %817 = vmatprep.subr.mxu1 %v1067_v0  ;;  %v495_v10 = vld [vmem:[#allocation6 + $0xc8] sm:$0xff] }
  0x49   : > { %786 = vmatprep.subr.mxu0 %v1067_v0  ;;  %818 = vmatpush3.msra.mxu1 %v375_v36 }
  0x4a   : > { %787 = vmatpush3.msra.mxu0 %v256_v11  ;;  %819 = vmatprep.subr.mxu1 %v1067_v0  ;;  %v494_v11 = vld [vmem:[#allocation6 + $0xc0] sm:$0xff] }
  0x4b   : > { %788 = vmatprep.subr.mxu0 %v1067_v0  ;;  %820 = vmatpush3.msra.mxu1 %v374_v37 }
  0x4c   : > { %789 = vmatpush3.msra.mxu0 %v255_v12  ;;  %821 = vmatprep.subr.mxu1 %v1067_v0  ;;  %v493_v12 = vld [vmem:[#allocation6 + $0xb8] sm:$0xff] }
  0x4d   : > { %790 = vmatprep.subr.mxu0 %v1067_v0  ;;  %822 = vmatpush3.msra.mxu1 %v373_v38 }
  0x4e   : > { %791 = vmatpush3.msra.mxu0 %v254_v13  ;;  %823 = vmatprep.subr.mxu1 %v1067_v0  ;;  %v492_v13 = vld [vmem:[#allocation6 + $0xb0] sm:$0xff] }
  0x4f   : > { %792 = vmatprep.subr.mxu0 %v1067_v0  ;;  %824 = vmatpush3.msra.mxu1 %v372_v39 }
  0x50   : > { %793 = vmatpush3.msra.mxu0 %v253_v14  ;;  %825 = vmatprep.subr.mxu1 %v1067_v0  ;;  %v491_v14 = vld [vmem:[#allocation6 + $0xa8] sm:$0xff] }
  0x51   : > { %794 = vmatprep.subr.mxu0 %v1067_v0  ;;  %826 = vmatpush3.msra.mxu1 %v371_v40 }
  0x52   : > { %795 = vmatpush3.msra.mxu0 %v252_v15  ;;  %827 = vmatprep.subr.mxu1 %v1067_v0  ;;  %v490_v15 = vld [vmem:[#allocation6 + $0xa0] sm:$0xff] }
  0x53   : > { %796 = vmatprep.subr.mxu0 %v1067_v0  ;;  %828 = vmatpush3.msra.mxu1 %v370_v41 }
  0x54   : > { %797 = vmatpush3.msra.mxu0 %v251_v16  ;;  %829 = vmatprep.subr.mxu1 %v1067_v0  ;;  %v489_v16 = vld [vmem:[#allocation6 + $0x98] sm:$0xff] }
  0x55   : > { %799 = vmatmul.mubr.f32.vlgmr.msra.gmra.mxu0 %v250_v17  ;;  %836 = vmatprep.subr.mxu0 %v1067_v0  ;;  %v488_v17 = vld [vmem:[#allocation6 + $0x90] sm:$0xff] }
  0x56   : > { %868 = vmatprep.mubr.msk.f32.mxu0 %vm1068_vm0, %v1067_v0  ;;  %830 = vmatpush3.msra.mxu1 %v369_v42 }
  0x57   : > { %831 = vmatprep.subr.mxu1 %v1067_v0  ;;  %837 = vmatpush3.msra.mxu0 %v501_v60 }
  0x58   : > { %832 = vmatpush3.msra.mxu1 %v368_v43  ;;  %838 = vmatprep.subr.mxu0 %v1067_v0 }
  0x59   : > { %839 = vmatpush3.msra.mxu0 %v500_v5 }
  0x5a   : > { %840 = vmatprep.subr.mxu0 %v1067_v0 }
  0x5b   : > { %841 = vmatpush3.msra.mxu0 %v499_v6 }
  0x5c   : > { %842 = vmatprep.subr.mxu0 %v1067_v0 }
  0x5d   : > { %843 = vmatpush3.msra.mxu0 %v498_v7 }
  0x5e   : > { %844 = vmatprep.subr.mxu0 %v1067_v0 }
  0x5f   : > { %845 = vmatpush3.msra.mxu0 %v497_v8 }
  0x60   : > { %846 = vmatprep.subr.mxu0 %v1067_v0 }
  0x61   : > { %847 = vmatpush3.msra.mxu0 %v496_v9 }
  0x62   : > { %848 = vmatprep.subr.mxu0 %v1067_v0 }
  0x63   : > { %849 = vmatpush3.msra.mxu0 %v495_v10 }
  0x64   : > { %850 = vmatprep.subr.mxu0 %v1067_v0 }
  0x65   : > { %851 = vmatpush3.msra.mxu0 %v494_v11 }
  0x66   : > { %852 = vmatprep.subr.mxu0 %v1067_v0 }
  0x67   : > { %853 = vmatpush3.msra.mxu0 %v493_v12 }
  0x68   : > { %854 = vmatprep.subr.mxu0 %v1067_v0 }
  0x69   : > { %855 = vmatpush3.msra.mxu0 %v492_v13 }
  0x6a   : > { %856 = vmatprep.subr.mxu0 %v1067_v0 }
  0x6b   : > { %857 = vmatpush3.msra.mxu0 %v491_v14 }
  0x6c   : > { %858 = vmatprep.subr.mxu0 %v1067_v0 }
  0x6d   : > { %859 = vmatpush3.msra.mxu0 %v490_v15 }
  0x6e   : > { %860 = vmatprep.subr.mxu0 %v1067_v0 }
  0x6f   : > { %861 = vmatpush3.msra.mxu0 %v489_v16 }
  0x70   : > { %862 = vmatprep.subr.mxu0 %v1067_v0 }
  0x71   : > { %863 = vmatpush3.msra.mxu0 %v488_v17 }
  0x72   : > { %864 = vmatprep.subr.mxu0 %v1067_v0 }
  0x73   : > { %865 = vmatpush3.msra.mxu0 %v487_v18 }
  0x74   : > { %866 = vmatprep.subr.mxu0 %v1067_v0 }
  0x75   : > { %867 = vmatpush3.msra.mxu0 %v486_v19 }
 0x115   : > { %v338_v24 = vpop.f32.mrf.mxu0 }
 0x116   : > { %v339_v25 = vadd.f32 %v338_v24, %v271_v23 }
 0x117   : > { %v800_v26 = vpop.f32.mrf.mxu0 }
 0x118   : > { %v342_v27 = vmax.f32 %v339_v25, 0.0 }
 0x11a   : > { %343 = vadd.xlane.f32.xlu0 %v342_v27  ;;  %v346_v28 = vmul.f32 %v342_v27, %v342_v27 }
 0x11e   : > { %347 = vadd.xlane.f32.xlu0 %v346_v28  ;;  %v476_v28 = vrot.slane %v1259_v61, %v1246_v51 }
 0x1a3   : > { %v344_v44 = vpop.xlane.xlu0 %343 }
 0x1a4   : > { %v345_v45 = vmul.f32 0.03125, %v344_v44 }
 0x1a6   : > { %v350_v47 = vmul.f32 %v345_v45, %v345_v45  ;;  %v354_v54 = vsub.f32 %v342_v27, %v345_v45 }
 0x1a7   : > { %v348_v46 = vpop.xlane.xlu0 %347 }
 0x1a8   : > { %v349_v48 = vmul.f32 0.03125, %v348_v46 }
 0x1aa   : > { %v351_v49 = vsub.f32 %v349_v48, %v350_v47 }
 0x1ac   : > { %v352_v50 = vadd.f32 1e-05, %v351_v49 }
 0x1ae   : > { %935 = vrsqrt.f32 %v352_v50  ;;  %v600_v50 = vrot.slane %v710_v34, %v1249_v52 }
 0x1bb   : > { %v936_v55 = vpop.eup %935 }
 0x1bc   : > { %v355_v56 = vmul.f32 %v936_v55, %v354_v54 }
 0x1be   : > { %v360_v58 = vmul.f32 %v359_v53, %v355_v56 }
 0x1c0   : > { %v365_v59 = vadd.f32 %v364_v57, %v360_v58 }
 0x1c2   : > { %834 = vmatmul.mubr.f32.vlgmr.msra.gmra.mxu1 %v365_v59 }
 0x282   : > { %v455_v63 = vpop.f32.mrf.mxu1 }
 0x283   : > { %v456_v1 = vadd.f32 %v455_v63, %v388_v62 }
 0x284   : > { %v835_v2 = vpop.f32.mrf.mxu1 }
 0x285   : > { %v459_v3 = vmax.f32 %v456_v1, 0.0 }
 0x287   : > { %460 = vadd.xlane.f32.xlu1 %v459_v3  ;;  %v463_v4 = vmul.f32 %v459_v3, %v459_v3 }
 0x28b   : > { %464 = vadd.xlane.f32.xlu1 %v463_v4 }
 0x310   : > { %v461_v20 = vpop.xlane.xlu1 %460 }
 0x311   : > { %v462_v22 = vmul.f32 0.03125, %v461_v20 }
 0x313   : > { %v467_v24 = vmul.f32 %v462_v22, %v462_v22  ;;  %v471_v29 = vsub.f32 %v459_v3, %v462_v22 }
 0x314   : > { %v465_v23 = vpop.xlane.xlu1 %464 }
 0x315   : > { %v466_v25 = vmul.f32 0.03125, %v465_v23 }
 0x317   : > { %v468_v26 = vsub.f32 %v466_v25, %v467_v24 }
 0x319   : > { %v469_v27 = vadd.f32 1e-05, %v468_v26 }
 0x31b   : > { %937 = vrsqrt.f32 %v469_v27 }
 0x328   : > { %v938_v30 = vpop.eup %937 }
 0x329   : > { %v472_v32 = vmul.f32 %v938_v30, %v471_v29 }
 0x32b   : > { %v477_v33 = vmul.f32 %v476_v28, %v472_v32 }
 0x32d   : > { %v482_v0 = vadd.f32 %v481_v31, %v477_v33 }
 0x32f   : > { %869 = vmatmul.mubr.f32.vlgmr.msra.gmra.mxu0 %v482_v0 }
 0x3ef   : > { %v574_v36 = vpop.f32.mrf.mxu0 }
 0x3f0   : > { %v575_v37 = vadd.f32 %v574_v36, %v507_v35 }
 0x3f1   : > { %v870_v38 = vpop.f32.mrf.mxu0 }
 0x3f2   : > { %v578_v39 = vmax.f32 %v575_v37, 0.0 }
 0x3f4   : > { %579 = vadd.xlane.f32.xlu0 %v578_v39  ;;  %v582_v40 = vmul.f32 %v578_v39, %v578_v39 }
 0x3f6   : > { %583 = vadd.xlane.f32.xlu1 %v582_v40 }
 0x47d   : > { %v580_v41 = vpop.xlane.xlu0 %579 }
 0x47e   : > { %v581_v42 = vmul.f32 0.03125, %v580_v41 }
 0x47f   : > { %v584_v43 = vpop.xlane.xlu1 %583 }
 0x480   : > { %v586_v44 = vmul.f32 %v581_v42, %v581_v42  ;;  %v585_v45 = vmul.f32 0.03125, %v584_v43  ;;  %v590_v48 = vsub.f32 %v578_v39, %v581_v42 }
 0x482   : > { %v587_v46 = vsub.f32 %v585_v45, %v586_v44 }
 0x484   : > { %v588_v47 = vadd.f32 1e-05, %v587_v46 }
 0x486   : > { %939 = vrsqrt.f32 %v588_v47 }
 0x493   : > { %v940_v49 = vpop.eup %939 }
 0x494   : > { %v591_v53 = vmul.f32 %v940_v49, %v590_v48 }
 0x496   : > { %v596_v54 = vmul.f32 %v595_v21, %v591_v53 }
 0x498   : > { %v601_v55 = vadd.f32 %v600_v50, %v596_v54 }
 0x49a   : > { %604 = vst [vmem:[%s245_s17] sm:$0xff] %v601_v55 }
 0x49b   : > { %1006 = shalt.err (!%p1003_p3)
}
 0x49c   : > { %s1007_s10 = scalar_lea.hbm %s617_s30, 128  ;;  %s1011_s13 = scalar_lea.hbm %s1326_s5, 256 }
 0x49d   : > { %p1008_p2 = scmp.ne.s32.totalorder %s617_s30, %s1007_s10  ;;  %p1012_p7 = scmp.lt.s32.totalorder %s617_s30, %s1326_s5 }
 0x49e   : > { %p1013_p6 = scmp.lt.s32.totalorder %s1011_s13, %s1007_s10 }
 0x49f   : > { %p1009_p4 = pnand %p1008_p2, %p1138_p5 }
 0x4a0   : > { %p1014_p9 = por %p1013_p6, %p1012_p7 }
 0x4a1   : > { %p1010_p13 = pneg %p1009_p4 }
 0x4a3   : > { %p1015_p10 = pnand %p1014_p9, %p1010_p13 }
 0x4a5   : > { %1018 = shalt.err (!%p1015_p10)
}
 0x4a6   : > { %879 = dma.vmem_to_hbm [thread:$0]  (%p1138_p5), %s620_s23, 128, %s617_s30, %s606_s6  }
 0x4a7 PF: > { %p896_p12 = scmp.ge.s32.totalorder %s1061_s21, 2  ;;  %s631_s16 = sand.u32 1, %s1049_s18  }
 0x4a8   : > { %p1336_p8 = scmp.ne.s32.totalorder %s1329_s29, 0  ;;  %s632_s17 = scalar_lea.sflag [#allocation5], %s631_s16 }
 0x4aa   : > { %p889_p11 = pnand %p896_p12, %p1336_p8 }
 0x4ac   : > { %p890_p0 = pneg %p889_p11 }
 0x4ae   : > { %1044 = dma.done.wait (%p890_p0), %s632_s17, 128  }
 0x4af   : > { %1046 = vsyncadd (%p890_p0), %s632_s17, 4294967168  ;;  %p17_p1 = scmp.ge.s32.totalorder %s1125_s24, 4   ;;  %s1337_s18 = smov %s1053_s19 }
 0x4b0   : > { %s1338_s19 = smov %s1057_s20  ;;  %s1339_s20 = smov %s1136_s27 }
 0x4b1   : > { %s1340_s21 = smov %s1125_s24  ;;  %19 = sbr.rel (!%p17_p1) target bundleno = 5 (0x5), region = 86 }
 0x4b6   :  { %637 = vsyncpa [#allocation4], 1 }
 0x4b7   :  { %639 = vsyncpa [#allocation4 + $0x1], 1 }
 0x4b8   :  { %640 = vsyncpa [#allocation7], 1 }
 0x4b9   :  { %641 = vsyncpa [#allocation5], 1 }
 0x4ba   :  { %643 = vsyncpa [#allocation5 + $0x1], 1 }

</bundles_post_ra>
